<compile_context>
chip_gen: v7x
topology: tpu7x:2x2x1
jax: 0.10.0
libtpu: 0.0.40
codegen_flags: <defaults>
</compile_context>

<pallas_src>
import functools

import jax
import jax.numpy as jnp
from jax import lax
from jax.experimental import pallas as pl
from jax.experimental.pallas import tpu as pltpu


def _lora_kernel(x_ref, at_ref, b_ref, o_ref, acc_ref, *, scale):
    # x_ref:   (bm, bk)        tile of x
    # at_ref:  (rank, bk)      tile of A^T (lane-dense along in_dim)
    # b_ref:   (rank, out_dim) B, fully resident in VMEM
    # o_ref:   (bm, out_dim)   output row-block (lane-dense, written once)
    # acc_ref: (bm, rank)      f32 accumulator for x @ A over the K axis
    k = pl.program_id(1)

    @pl.when(k == 0)
    def _init():
        acc_ref[...] = jnp.zeros_like(acc_ref)

    # Partial x @ A for this K slice: contract x's dim 1 with A^T's dim 1.
    acc_ref[...] += lax.dot_general(
        x_ref[...], at_ref[...],
        dimension_numbers=(((1,), (1,)), ((), ())),
        preferred_element_type=jnp.float32)

    @pl.when(k == pl.num_programs(1) - 1)
    def _finalize():
        # Scale the tiny (bm, rank) intermediate and keep it in f32 for the
        # rank-contraction (precision fix); B is tiny so the f32 up-cast is
        # negligible in an HBM-bound kernel.
        xa = scale * acc_ref[...]
        b = b_ref[...].astype(jnp.float32)
        o_ref[...] = jnp.dot(
            xa, b, preferred_element_type=jnp.float32).astype(o_ref.dtype)


@functools.partial(
    jax.jit, static_argnames=("scaling", "block_m", "block_k"))
def lora_forward(x, A, B, scaling, *, block_m=256, block_k=2048):
    """y = scaling * (x @ A @ B), computed with a tiled Pallas TPU kernel."""
    batch, in_dim = x.shape
    rank, out_dim = B.shape
    assert A.shape == (in_dim, rank)

    # Lane-dense layout for A: (rank, in_dim). One-time, tiny transpose.
    A_t = A.T

    # K tiling: only tile the reduction when block_k divides in_dim exactly;
    # otherwise keep the whole reduction in a single block so no out-of-bounds
    # (garbage) elements can be accumulated into valid rows.
    if in_dim > block_k and in_dim % block_k == 0:
        bk = block_k
    else:
        bk = in_dim

    bm = min(block_m, batch)
    itemsize = jnp.dtype(x.dtype).itemsize

    # Rough VMEM footprint: double-buffered x and y tiles + resident A^T/B +
    # acc scratch (rank pads to one 128-lane vreg column). Shrink bm if this
    # would not fit comfortably inside v7x's 64 MiB physical VMEM.
    def _footprint(bm_):
        return (2 * bm_ * bk * itemsize               # x (double-buffered)
                + 2 * bm_ * out_dim * itemsize        # y (double-buffered)
                + rank * in_dim * jnp.dtype(A.dtype).itemsize
                + rank * out_dim * jnp.dtype(B.dtype).itemsize
                + bm_ * 128 * 4)                      # acc scratch

    vmem_budget = 40 * 1024 * 1024
    while _footprint(bm) > vmem_budget and bm % 16 == 0 and bm > 16:
        bm //= 2

    grid = (pl.cdiv(batch, bm), pl.cdiv(in_dim, bk))

    flops = 2 * batch * in_dim * rank + 2 * batch * rank * out_dim
    bytes_accessed = (
        batch * in_dim * itemsize                              # x (read once)
        + in_dim * rank * jnp.dtype(A.dtype).itemsize          # A
        + rank * out_dim * jnp.dtype(B.dtype).itemsize         # B
        + batch * out_dim * itemsize)                          # y

    # Explicit scoped-VMEM budget: v5e's default is only 16 MiB; stay <= 48 MiB
    # so v7x's 64 MiB physical VMEM keeps double-buffering headroom.
    vmem_limit = int(min(max(32 * 1024 * 1024, _footprint(bm) + (4 << 20)),
                         48 * 1024 * 1024))

    kernel = functools.partial(_lora_kernel, scale=float(scaling))

    return pl.pallas_call(
        kernel,
        out_shape=jax.ShapeDtypeStruct((batch, out_dim), x.dtype),
        grid_spec=pltpu.PrefetchScalarGridSpec(
            num_scalar_prefetch=0,
            grid=grid,
            in_specs=[
                # x: streamed once, tiled over (batch, in_dim).
                pl.BlockSpec((bm, bk), lambda i, k: (i, k)),
                # A^T: tiled over in_dim only (tiny: rank sublanes).
                pl.BlockSpec((rank, bk), lambda i, k: (0, k)),
                # B: fully resident in VMEM, fetched once (grid-invariant).
                pl.BlockSpec((rank, out_dim), lambda i, k: (0, 0)),
            ],
            # Full out_dim per row-block -> lane-dense, unmasked stores and no
            # re-read of x per output tile.
            out_specs=pl.BlockSpec((bm, out_dim), lambda i, k: (i, 0)),
            scratch_shapes=[pltpu.VMEM((bm, rank), jnp.float32)],
        ),
        compiler_params=pltpu.CompilerParams(
            dimension_semantics=("parallel", "arbitrary"),
            vmem_limit_bytes=vmem_limit,
        ),
        cost_estimate=pl.CostEstimate(
            flops=flops, transcendentals=0, bytes_accessed=bytes_accessed),
    )(x, A_t, B)


def _check(out, ref, tol):
    """Max-abs error scaled by max |ref| — robust to near-zero elements."""
    out32 = out.astype(jnp.float32)
    ref32 = ref.astype(jnp.float32)
    err = float(jnp.max(jnp.abs(out32 - ref32)))
    scale = float(jnp.max(jnp.abs(ref32))) + 1e-6
    assert err <= tol * scale, (err, scale, tol)


if __name__ == "__main__":
    # Small, lane-friendly demo shapes consistent with the module contract.
    rank = 4
    alpha = 8.0
    in_dim = 256
    out_dim = 256
    batch = 16
    scaling = alpha / rank

    key = jax.random.PRNGKey(0)
    k_x, k_a, k_b = jax.random.split(key, 3)

    # Parameter init matching the PyTorch __init__:
    #   A ~ randn(in_dim, rank), B = zeros(rank, out_dim)
    A = jax.random.normal(k_a, (in_dim, rank), dtype=jnp.float32)
    B = jnp.zeros((rank, out_dim), dtype=jnp.float32)
    x = jax.random.normal(k_x, (batch, in_dim), dtype=jnp.float32)

    out = jax.block_until_ready(lora_forward(x, A, B, scaling))
    ref = scaling * (x @ A @ B)
    assert out.shape == (batch, out_dim)
    _check(out, ref + 0.0, 1e-2)   # B == 0 -> both are (near) zero

    # Non-zero B (exercise the real matmul path).
    B2 = jax.random.normal(k_b, (rank, out_dim), dtype=jnp.float32)
    out2 = jax.block_until_ready(lora_forward(x, A, B2, scaling))
    ref2 = scaling * (x @ A @ B2)
    _check(out2, ref2, 1e-2)

    # bf16 inputs with f32 accumulation (halves HBM traffic on real shapes).
    xb = x.astype(jnp.bfloat16)
    Ab = A.astype(jnp.bfloat16)
    Bb = B2.astype(jnp.bfloat16)
    out3 = jax.block_until_ready(lora_forward(xb, Ab, Bb, scaling))
    ref3 = scaling * (xb.astype(jnp.float32) @ Ab.astype(jnp.float32)
                      @ Bb.astype(jnp.float32))
    _check(out3, ref3, 2e-2)

    print("KERNEL_OK")
</pallas_src>

<mosaic_0001>
module attributes {stable_mosaic.version = 11 : i64} {
  func.func @_lora_kernel(%arg0: i32, %arg1: i32, %arg2: memref<16x256xf32, #tpu.memory_space<vmem>>, %arg3: memref<4x256xf32, #tpu.memory_space<vmem>>, %arg4: memref<4x256xf32, #tpu.memory_space<vmem>>, %arg5: memref<16x256xf32, #tpu.memory_space<vmem>>, %arg6: memref<16x4xf32, #tpu.memory_space<vmem>>) attributes {dimension_semantics = [#tpu.dimension_semantics<parallel>, #tpu.dimension_semantics<arbitrary>], iteration_bounds = array<i64: 1, 1>, scalar_prefetch = 0 : i64, scratch_operands = 1 : i64, tpu.core_type = #tpu.core_type<tc>, window_params = [{transform_indices = @transform_0, window_bounds = array<i64: 16, 256>}, {transform_indices = @transform_1, window_bounds = array<i64: 4, 256>}, {pipeline_mode = #tpu.pipeline_mode<synchronous>, transform_indices = @transform_2, window_bounds = array<i64: 4, 256>}, {transform_indices = @transform_3, window_bounds = array<i64: 16, 256>}]} {
    %c0_i32 = arith.constant 0 : i32
    %0 = arith.cmpi eq, %arg1, %c0_i32 : i32
    %1 = arith.extui %0 : i1 to i32
    %c0_i32_0 = arith.constant 0 : i32
    %2 = arith.cmpi ne, %1, %c0_i32_0 : i32
    scf.if %2 {
      %cst_10 = arith.constant 0.000000e+00 : f32
      %12 = vector.broadcast %cst_10 : f32 to vector<16x4xf32>
      %c0_11 = arith.constant 0 : index
      %c0_12 = arith.constant 0 : index
      %13 = vector.load %arg6[%c0_11, %c0_12] : memref<16x4xf32, #tpu.memory_space<vmem>>, vector<16x4xf32>
      tpu.vector_store %arg6[%c0_11, %c0_12], %12 {strides = array<i32>} : memref<16x4xf32, #tpu.memory_space<vmem>>, vector<16x4xf32>,
    } else {
    }
    %c0 = arith.constant 0 : index
    %c0_1 = arith.constant 0 : index
    %3 = vector.load %arg6[%c0, %c0_1] : memref<16x4xf32, #tpu.memory_space<vmem>>, vector<16x4xf32>
    %c0_2 = arith.constant 0 : index
    %c0_3 = arith.constant 0 : index
    %4 = vector.load %arg2[%c0_2, %c0_3] : memref<16x256xf32, #tpu.memory_space<vmem>>, vector<16x256xf32>
    %c0_4 = arith.constant 0 : index
    %c0_5 = arith.constant 0 : index
    %5 = vector.load %arg3[%c0_4, %c0_5] : memref<4x256xf32, #tpu.memory_space<vmem>>, vector<4x256xf32>
    %cst = arith.constant dense<0.000000e+00> : vector<16x4xf32>
    %6 = tpu.matmul %4, %5, %cst {dimension_numbers = #tpu.dot_dimension_numbers<[1], [1], [0], [0], [0, 0, 1, 0], [], []>} : vector<16x256xf32>, vector<4x256xf32>, vector<16x4xf32> -> vector<16x4xf32>
    %7 = arith.addf %3, %6 : vector<16x4xf32>
    %c0_6 = arith.constant 0 : index
    %c0_7 = arith.constant 0 : index
    %8 = vector.load %arg6[%c0_6, %c0_7] : memref<16x4xf32, #tpu.memory_space<vmem>>, vector<16x4xf32>
    tpu.vector_store %arg6[%c0_6, %c0_7], %7 {strides = array<i32>} : memref<16x4xf32, #tpu.memory_space<vmem>>, vector<16x4xf32>,
    %c0_i32_8 = arith.constant 0 : i32
    %9 = arith.cmpi eq, %arg1, %c0_i32_8 : i32
    %10 = arith.extui %9 : i1 to i32
    %c0_i32_9 = arith.constant 0 : i32
    %11 = arith.cmpi ne, %10, %c0_i32_9 : i32
    scf.if %11 {
      %c0_10 = arith.constant 0 : index
      %c0_11 = arith.constant 0 : index
      %12 = vector.load %arg6[%c0_10, %c0_11] : memref<16x4xf32, #tpu.memory_space<vmem>>, vector<16x4xf32>
      %cst_12 = arith.constant 2.000000e+00 : f32
      %13 = vector.broadcast %cst_12 : f32 to vector<16x4xf32>
      %14 = arith.mulf %13, %12 : vector<16x4xf32>
      %c0_13 = arith.constant 0 : index
      %c0_14 = arith.constant 0 : index
      %15 = vector.load %arg4[%c0_13, %c0_14] : memref<4x256xf32, #tpu.memory_space<vmem>>, vector<4x256xf32>
      %cst_15 = arith.constant dense<0.000000e+00> : vector<16x256xf32>
      %16 = tpu.matmul %14, %15, %cst_15 {dimension_numbers = #tpu.dot_dimension_numbers<[1], [0], [0], [1], [0, 0, 1, 1], [], []>} : vector<16x4xf32>, vector<4x256xf32>, vector<16x256xf32> -> vector<16x256xf32>
      %c0_16 = arith.constant 0 : index
      %c0_17 = arith.constant 0 : index
      %17 = vector.load %arg5[%c0_16, %c0_17] : memref<16x256xf32, #tpu.memory_space<vmem>>, vector<16x256xf32>
      tpu.vector_store %arg5[%c0_16, %c0_17], %16 {strides = array<i32>} : memref<16x256xf32, #tpu.memory_space<vmem>>, vector<16x256xf32>,
    } else {
    }
    return
  }
  func.func @transform_0(%arg0: i32, %arg1: i32) -> (i32, i32) {
    %c0_i32 = arith.constant 0 : i32
    return %arg0, %arg1 : i32, i32
  }
  func.func @transform_1(%arg0: i32, %arg1: i32) -> (i32, i32) {
    %c0_i32 = arith.constant 0 : i32
    %c0_i32_0 = arith.constant 0 : i32
    return %c0_i32, %arg1 : i32, i32
  }
  func.func @transform_2(%arg0: i32, %arg1: i32) -> (i32, i32) {
    %c0_i32 = arith.constant 0 : i32
    %c0_i32_0 = arith.constant 0 : i32
    %c0_i32_1 = arith.constant 0 : i32
    return %c0_i32, %c0_i32_0 : i32, i32
  }
  func.func @transform_3(%arg0: i32, %arg1: i32) -> (i32, i32) {
    %c0_i32 = arith.constant 0 : i32
    %c0_i32_0 = arith.constant 0 : i32
    return %arg0, %c0_i32 : i32, i32
  }
}

</mosaic_0001>

<bundles_post_ra>
// kernel: lora_forward.1
= control target key start
LH: loop header
LB: loop body
LE: loop exit
PB: predicated region body
PF: predicated region fallthrough
CT: control target
= control target key end

     0   :  { %8 = vsyncpa [#allocation4], 0  ;;  %s419_s0 = inlined_call_operand.hbm [shape: f32[16,256], index: 0, kind: input, shape index: {}]   ;;  %s420_s1 = inlined_call_operand.hbm [shape: f32[4,256], index: 1, kind: input, shape index: {}]   ;;  %s421_s2 = inlined_call_operand.vmem [shape: f32[4,256], index: 2, kind: input, shape index: {}]   ;;  %s422_s3 = inlined_call_operand.hbm [shape: f32[16,256], index: 3, kind: output, shape index: {}]  }
   0x1   :  { %9 = vsyncpa [#allocation7], 0 }
   0x2   :  { %10 = vsyncpa [#allocation5], 0  ;;  %s342_s12 = smov [#allocation3]   ;;  %s270_s16 = scalar_lea.hbm %s419_s0, 512 }
   0x3   :  { %s16_s13 = sshll.u32 %s342_s12, 4  ;;  %p271_p0 = scmp.ne.s32.totalorder %s419_s0, %s270_s16  ;;  %s17_s13 = int_to_ptr.vmem [resolvable:$true] %s16_s13 }
   0x4   :  { %p274_p1 = scmp.lt.u32.totalorder %s270_s16, %s419_s0 }
   0x6   :  { %p276_p2 = pnand %p274_p1, %p271_p0 }
   0x8   :  { %279 = shalt.err (!%p276_p2)
}
   0x9   :  { %s280_s21 = scalar_lea.vmem %s17_s13, 512  ;;  %p285_p4 = scmp.lt.s32.totalorder %s17_s13, %s17_s13 }
   0xa   :  { %p281_p3 = scmp.ne.s32.totalorder %s17_s13, %s280_s21  ;;  %p286_p5 = scmp.lt.s32.totalorder %s280_s21, %s280_s21 }
   0xc   :  { %p287_p6 = por %p286_p5, %p285_p4 }
   0xe   :  { %p288_p7 = pnand %p287_p6, %p281_p3 }
  0x10   :  { %291 = shalt.err (!%p288_p7)
}
  0x11   :  { %s343_s22 = smov 256   ;;  %s344_s23 = smov 16  }
  0x12   :  { %22 = dma.hbm_to_vmem [thread:$0]  %s419_s0, 512, %s17_s13, [#allocation4], %s343_s22, %s343_s22, %s344_s23  }
  0x13   :  { %s345_s26 = smov [#allocation6]   ;;  %s292_s30 = scalar_lea.hbm %s420_s1, 128 }
  0x14   :  { %s29_s27 = sshll.u32 %s345_s26, 4  ;;  %p293_p8 = scmp.ne.s32.totalorder %s420_s1, %s292_s30  ;;  %s30_s27 = int_to_ptr.vmem [resolvable:$true] %s29_s27 }
  0x15   :  { %p296_p9 = scmp.lt.u32.totalorder %s292_s30, %s420_s1 }
  0x17   :  { %p298_p10 = pnand %p296_p9, %p293_p8 }
  0x19   :  { %301 = shalt.err (!%p298_p10)
}
  0x1a   :  { %s302_s8 = scalar_lea.vmem %s30_s27, 128  ;;  %p307_p12 = scmp.lt.s32.totalorder %s30_s27, %s30_s27 }
  0x1b   :  { %p303_p11 = scmp.ne.s32.totalorder %s30_s27, %s302_s8  ;;  %p308_p13 = scmp.lt.s32.totalorder %s302_s8, %s302_s8 }
  0x1d   :  { %p309_p0 = por %p308_p13, %p307_p12 }
  0x1f   :  { %p310_p1 = pnand %p309_p0, %p303_p11 }
  0x21   :  { %313 = shalt.err (!%p310_p1)
}
  0x22   :  { %32 = dma.hbm_to_vmem [thread:$0]  %s420_s1, 128, %s30_s27, [#allocation7]  }
  0x23   :  { %336 = dma.done.wait [#allocation4], 512  }
  0x24   :  { %337 = vsyncadd [#allocation4], 4294966784 }
  0x25   :  { %338 = dma.done.wait [#allocation7], 128  }
  0x26   :  { %339 = vsyncadd [#allocation7], 4294967168  ;;  %vm45_vm0 = vcmask 31744   ;;  %v346_v0 = vmov 0.0   ;;  %v54_v1 = vld [vmem:[#allocation6] sm:$0xff]  ;;  %v51_v2 = vld [vmem:[#allocation3 + $0x8] sm:$0xff] }
  0x27   :  { %46 = vst.msk [vmem:[#allocation2] sm:$0xff] %vm45_vm0, %v346_v0  ;;  %47 = vst.msk [vmem:[#allocation2 + $0x8] sm:$0xff] %vm45_vm0, %v346_v0  ;;  %223 = vmatprep.mubr.f32.mxu1 %v346_v0  ;;  %v56_v3 = vcombine.high %v54_v1, %v54_v1  ;;  %122 = vmatprep.mubr.f32.mxu0 %v51_v2  ;;  %v50_v4 = vld [vmem:[#allocation3] sm:$0xff]  ;;  %v53_v5 = vld [vmem:[#allocation3 + $0x18] sm:$0xff]  ;;  %vm154_vm1 = vcmask 1043456  }
  0x28   :  { %v52_v6 = vld [vmem:[#allocation3 + $0x10] sm:$0xff] }
  0x29   :  { %58 = vmatprep.subr.mxu0 %v56_v3  ;;  %v145_v7 = vld [vmem:[%s421_s2] sm:$0xff]  ;;  %s347_s2 = smov [#allocation8]  }
  0x2a   :  { %59 = vmatpush1.xpose.msra.mxu0 %v54_v1  ;;  %v147_v8 = vcombine.high %v145_v7, %v145_v7  ;;  %s245_s11 = sshll.u32 %s347_s2, 4  ;;  %s246_s11 = int_to_ptr.vmem [resolvable:$true] %s245_s11 }
  0x2b   :  { %s314_s12 = scalar_lea.vmem %s246_s11, 512  ;;  %p319_p3 = scmp.lt.s32.totalorder %s246_s11, %s246_s11 }
  0x2c   :  { %258 = vmatprep.subr.msk.mxu1 %vm154_vm1, %v147_v8  ;;  %p315_p2 = scmp.ne.s32.totalorder %s246_s11, %s314_s12  ;;  %p320_p4 = scmp.lt.s32.totalorder %s314_s12, %s314_s12 }
  0x2d   :  { %123 = vmatmul.mubr.f32.vlgmr.msra.gmra.mrb[0].mxu0 %v50_v4  ;;  %259 = vmatpush1.msk.msra.mxu1 %vm154_vm1, %v145_v7 }
  0x2e   :  { %127 = vmatprep.mubr.f32.mxu0 %v53_v5  ;;  %v48_v9 = vld [vmem:[#allocation2] sm:$0xff]  ;;  %v49_v13 = vld [vmem:[#allocation2 + $0x8] sm:$0xff]  ;;  %p321_p5 = por %p320_p4, %p319_p3 }
  0x30   :  { %p322_p6 = pnand %p321_p5, %p315_p2 }
  0x31   :  { %128 = vmatmul.mubr.f32.gmra.mrb[2].mxu0 %v52_v6 }
 0x100   :  { %v124_v10 = vpop.f32.mrb[0].mxu0 }
 0x101   :  { %v133_v11 = vadd.f32 %v124_v10, %v48_v9  ;;  %v126_v12 = vpop.f32.mrb[1].mxu0 }
 0x103   :  { %136 = vst.msk [vmem:[#allocation2] sm:$0xff] %vm45_vm0, %v133_v11 }
 0x104   :  { %v129_v14 = vpop.f32.mrb[2].mxu0 }
 0x105   :  { %v134_v15 = vadd.f32 %v129_v14, %v49_v13  ;;  %v131_v16 = vpop.f32.mrb[3].mxu0 }
 0x107   :  { %137 = vst.msk [vmem:[#allocation2 + $0x8] sm:$0xff] %vm45_vm0, %v134_v15 }
 0x10a   :  { %v141_v17 = vld [vmem:[#allocation2] sm:$0xff] }
 0x10b   :  { %v143_v18 = vmul.f32 2.0, %v141_v17 }
 0x10d   :  { %260 = vmatmul.mubr.msk.f32.vlgmr.msra.gmra.mrb[0].mxu1 %vm45_vm0, %v143_v18 }
 0x10e   :  { %229 = vmatprep.mubr.f32.mxu1 %v346_v0  ;;  %v142_v19 = vld [vmem:[#allocation2 + $0x8] sm:$0xff] }
 0x10f   :  { %v144_v20 = vmul.f32 2.0, %v142_v19 }
 0x111   :  { %261 = vmatmul.mubr.msk.f32.gmra.mrb[2].mxu1 %vm45_vm0, %v144_v20 }
 0x1e0   :  { %v225_v21 = vpop.f32.mrb[0].mxu1 }
 0x1e1   :  { %236 = vst [vmem:[#allocation8] sm:$0xff] %v225_v21  ;;  %v227_v22 = vpop.f32.mrb[1].mxu1 }
 0x1e2   :  { %237 = vst [vmem:[#allocation8 + $0x8] sm:$0xff] %v227_v22 }
 0x1e4   :  { %v231_v23 = vpop.f32.mrb[2].mxu1 }
 0x1e5   :  { %238 = vst [vmem:[#allocation8 + $0x10] sm:$0xff] %v231_v23  ;;  %v233_v24 = vpop.f32.mrb[3].mxu1 }
 0x1e6   :  { %239 = vst [vmem:[#allocation8 + $0x18] sm:$0xff] %v233_v24 }
 0x1e7   :  { %325 = shalt.err (!%p322_p6)
}
 0x1e8   :  { %s326_s15 = scalar_lea.hbm %s422_s3, 512 }
 0x1e9   :  { %p327_p7 = scmp.ne.s32.totalorder %s422_s3, %s326_s15  ;;  %p330_p8 = scmp.lt.u32.totalorder %s326_s15, %s422_s3 }
 0x1eb   :  { %p332_p9 = pnand %p330_p8, %p327_p7 }
 0x1ed   :  { %335 = shalt.err (!%p332_p9)
}
 0x1ee   :  { %251 = dma.vmem_to_hbm [thread:$0]  %s246_s11, 512, %s422_s3, [#allocation5], %s343_s22, %s343_s22, %s344_s23  }
 0x1ef   :  { %340 = dma.done.wait [#allocation5], 512  }
 0x1f0   :  { %341 = vsyncadd [#allocation5], 4294966784 }
 0x1f1   :  { %255 = vsyncpa [#allocation4], 1 }
 0x1f2   :  { %256 = vsyncpa [#allocation7], 1 }
 0x1f3   :  { %257 = vsyncpa [#allocation5], 1 }

</bundles_post_ra>
